<compile_context>
chip_gen: v5e
topology: v5e:2x2
jax: 0.10.0
libtpu: 0.0.40
codegen_flags: <defaults>
</compile_context>

<pallas_src>
import functools

import jax
import jax.numpy as jnp
from jax.experimental import pallas as pl
from jax.experimental.pallas import tpu as pltpu


F_IN = 7
F_PAD = 8                    # input features padded 7 -> 8 (sublane-aligned)
H1, H2, H3 = 128, 128, 64    # hidden widths (126 -> 128 padded)


def mlp_kernel(x_ref, w1_ref, b1_ref, w2_ref, b2_ref, w3_ref, b3_ref,
               w4_ref, b4_ref, o_ref):
    # x tile (feature-major): (8, TB) f32 -> bf16 for the MXU.
    xT = x_ref[...].astype(jnp.bfloat16)

    # l1: (128,8) @ (8,TB) + b1 -> ReLU    (padded rows are exact zeros)
    h = jnp.dot(w1_ref[...], xT, preferred_element_type=jnp.float32) + b1_ref[...]
    h = jnp.maximum(h, 0.0)
    # dropout(p=0.1): identity in eval mode
    # TODO(synk): training-mode stochastic dropout (pltpu.prng_*) omitted.

    # l2: (128,128) @ (128,TB) + b2 -> ReLU
    h = jnp.dot(w2_ref[...], h.astype(jnp.bfloat16),
                preferred_element_type=jnp.float32) + b2_ref[...]
    h = jnp.maximum(h, 0.0)

    # l3: (64,128) @ (128,TB) + b3 -> ReLU
    h = jnp.dot(w3_ref[...], h.astype(jnp.bfloat16),
                preferred_element_type=jnp.float32) + b3_ref[...]
    h = jnp.maximum(h, 0.0)

    # l4: (1,64) @ (64,TB) + b4 -> Sigmoid  (lane-dense (1,TB) row, no transpose)
    y = jnp.dot(w4_ref[...], h.astype(jnp.bfloat16),
                preferred_element_type=jnp.float32) + b4_ref[...]
    o_ref[...] = jax.nn.sigmoid(y)[None, :, :].astype(o_ref.dtype)


def _round_up(n, m):
    return ((n + m - 1) // m) * m


def _prepare_params(params):
    """Transpose to feature-major, pad 126->128 / 7->8 with exact zeros, cast
    matmul weights to bf16 (biases stay f32)."""
    f32, bf16 = jnp.float32, jnp.bfloat16
    # params["wN"] are (in, out); kernel wants (out_pad, in_pad).
    w1t = jnp.zeros((H1, F_PAD), bf16).at[:126, :F_IN].set(params["w1"].T.astype(bf16))
    b1t = jnp.zeros((H1, 1), f32).at[:126, :].set(params["b1"].reshape(-1, 1).astype(f32))
    w2t = jnp.zeros((H2, H1), bf16).at[:126, :126].set(params["w2"].T.astype(bf16))
    b2t = jnp.zeros((H2, 1), f32).at[:126, :].set(params["b2"].reshape(-1, 1).astype(f32))
    w3t = jnp.zeros((H3, H2), bf16).at[:, :126].set(params["w3"].T.astype(bf16))
    b3t = params["b3"].reshape(-1, 1).astype(f32)        # (64, 1)
    w4t = params["w4"].T.astype(bf16)                    # (1, 64)
    b4 = params["b4"].astype(f32)                        # (1, 1)
    return w1t, b1t, w2t, b2t, w3t, b3t, w4t, b4


@functools.partial(jax.jit, static_argnames=("block_rows",))
def lmodel_forward(x, params, *, block_rows=4096):
    """x: (B, 7) float32. params: f32 weights (in,out)/(1,out) as in init_params."""
    B, F = x.shape
    assert F == F_IN
    w1t, b1t, w2t, b2t, w3t, b3t, w4t, b4 = _prepare_params(params)

    # Batch tile: multiple of 128, capped at block_rows. Once the batch exceeds
    # a single 128 tile, keep >= 2 tiles so the parallel axis can shard across
    # both TensorCores on v7x.
    B128 = _round_up(B, 128)
    if B128 <= 128:
        TB = 128
    else:
        TB = min(block_rows, _round_up(-(-B128 // 2), 128))
    num_tiles = pl.cdiv(B128, TB)
    B_pad = num_tiles * TB

    # Feature-major input: (8, B_pad), zero-padded (rows 7.., cols B..).
    xT = jnp.zeros((F_PAD, B_pad), x.dtype).at[:F_IN, :B].set(jnp.transpose(x))

    weight_bytes = sum(int(a.size) * a.dtype.itemsize
                       for a in (w1t, b1t, w2t, b2t, w3t, b3t, w4t, b4))
    cost = pl.CostEstimate(
        flops=2 * B_pad * (F_IN * H1 + H1 * H2 + H2 * H3 + H3),
        transcendentals=B_pad,                       # one exp per row (sigmoid)
        bytes_accessed=B_pad * (F_PAD * 4 + 4) + weight_bytes,
    )

    const = lambda a: pl.BlockSpec(a.shape, lambda i: (0,) * a.ndim)

    out_rows = pl.pallas_call(
        mlp_kernel,
        out_shape=jax.ShapeDtypeStruct((num_tiles, 1, TB), jnp.float32),
        grid=(num_tiles,),
        in_specs=[
            pl.BlockSpec((F_PAD, TB), lambda i: (0, i)),   # lane-dense x tile
            const(w1t), const(b1t), const(w2t), const(b2t),
            const(w3t), const(b3t), const(w4t), const(b4),
        ],
        out_specs=pl.BlockSpec((1, 1, TB), lambda i: (i, 0, 0)),
        compiler_params=pltpu.CompilerParams(
            dimension_semantics=("parallel",),
            vmem_limit_bytes=32 << 20,
        ),
        cost_estimate=cost,
    )(xT, w1t, b1t, w2t, b2t, w3t, b3t, w4t, b4)

    # (num_tiles, 1, TB) rows -> (B, 1) column (tile-major == batch-major).
    return out_rows.reshape(B_pad, 1)[:B]


def init_params(key):
    """Deterministic init mimicking PyTorch Linear default (uniform ±1/sqrt(fan_in)).
    Weights stored transposed (in_dim, out_dim), unpadded, f32."""
    dims = [(7, 126), (126, 126), (126, 64), (64, 1)]
    params = {}
    keys = jax.random.split(key, 2 * len(dims))
    for i, (fan_in, fan_out) in enumerate(dims):
        bound = 1.0 / jnp.sqrt(float(fan_in))
        w = jax.random.uniform(keys[2 * i], (fan_in, fan_out),
                               minval=-bound, maxval=bound, dtype=jnp.float32)
        b = jax.random.uniform(keys[2 * i + 1], (1, fan_out),
                               minval=-bound, maxval=bound, dtype=jnp.float32)
        params[f"w{i + 1}"] = w
        params[f"b{i + 1}"] = b
    return params


if __name__ == "__main__":
    key = jax.random.PRNGKey(0)
    pkey, xkey = jax.random.split(key)
    params = init_params(pkey)

    batch = 8
    x = jax.random.normal(xkey, (batch, F_IN), dtype=jnp.float32)

    out = lmodel_forward(x, params)
    jax.block_until_ready(out)

    # Pure-JAX f32 reference (kernel uses bf16 matmul operands -> loose tolerance).
    def ref(x, p):
        h = jnp.maximum(x @ p["w1"] + p["b1"], 0.0)
        h = jnp.maximum(h @ p["w2"] + p["b2"], 0.0)
        h = jnp.maximum(h @ p["w3"] + p["b3"], 0.0)
        return jax.nn.sigmoid(h @ p["w4"] + p["b4"])

    expected = ref(x, params)
    assert out.shape == (batch, 1)
    err = float(jnp.max(jnp.abs(out - expected)))
    assert jnp.allclose(out, expected, atol=2e-2, rtol=2e-2), f"max abs err {err}"
    print("KERNEL_OK")
</pallas_src>

<mosaic_0001>
module attributes {stable_mosaic.version = 11 : i64} {
  func.func @mlp_kernel(%arg0: i32, %arg1: memref<8x128xf32, #tpu.memory_space<vmem>>, %arg2: memref<128x8xbf16, #tpu.memory_space<vmem>>, %arg3: memref<128x1xf32, #tpu.memory_space<vmem>>, %arg4: memref<128x128xbf16, #tpu.memory_space<vmem>>, %arg5: memref<128x1xf32, #tpu.memory_space<vmem>>, %arg6: memref<64x128xbf16, #tpu.memory_space<vmem>>, %arg7: memref<64x1xf32, #tpu.memory_space<vmem>>, %arg8: memref<1x64xbf16, #tpu.memory_space<vmem>>, %arg9: memref<1x1xf32, #tpu.memory_space<vmem>>, %arg10: memref<1x1x128xf32, #tpu.memory_space<vmem>>) attributes {dimension_semantics = [#tpu.dimension_semantics<parallel>], iteration_bounds = array<i64: 1>, scalar_prefetch = 0 : i64, scratch_operands = 0 : i64, tpu.core_type = #tpu.core_type<tc>, window_params = [{transform_indices = @transform_0, window_bounds = array<i64: 8, 128>}, {pipeline_mode = #tpu.pipeline_mode<synchronous>, transform_indices = @transform_1, window_bounds = array<i64: 128, 8>}, {pipeline_mode = #tpu.pipeline_mode<synchronous>, transform_indices = @transform_2, window_bounds = array<i64: 128, 1>}, {pipeline_mode = #tpu.pipeline_mode<synchronous>, transform_indices = @transform_3, window_bounds = array<i64: 128, 128>}, {pipeline_mode = #tpu.pipeline_mode<synchronous>, transform_indices = @transform_4, window_bounds = array<i64: 128, 1>}, {pipeline_mode = #tpu.pipeline_mode<synchronous>, transform_indices = @transform_5, window_bounds = array<i64: 64, 128>}, {pipeline_mode = #tpu.pipeline_mode<synchronous>, transform_indices = @transform_6, window_bounds = array<i64: 64, 1>}, {pipeline_mode = #tpu.pipeline_mode<synchronous>, transform_indices = @transform_7, window_bounds = array<i64: 1, 64>}, {pipeline_mode = #tpu.pipeline_mode<synchronous>, transform_indices = @transform_8, window_bounds = array<i64: 1, 1>}, {transform_indices = @transform_9, window_bounds = array<i64: 1, 1, 128>}]} {
    %c0 = arith.constant 0 : index
    %c0_0 = arith.constant 0 : index
    %0 = vector.load %arg1[%c0, %c0_0] : memref<8x128xf32, #tpu.memory_space<vmem>>, vector<8x128xf32>
    %1 = arith.truncf %0 : vector<8x128xf32> to vector<8x128xbf16>
    %c0_1 = arith.constant 0 : index
    %c0_2 = arith.constant 0 : index
    %2 = vector.load %arg2[%c0_1, %c0_2] : memref<128x8xbf16, #tpu.memory_space<vmem>>, vector<128x8xbf16>
    %cst = arith.constant dense<0.000000e+00> : vector<128x128xf32>
    %3 = tpu.matmul %2, %1, %cst {dimension_numbers = #tpu.dot_dimension_numbers<[1], [0], [0], [1], [0, 0, 1, 1], [], []>} : vector<128x8xbf16>, vector<8x128xbf16>, vector<128x128xf32> -> vector<128x128xf32>
    %c0_3 = arith.constant 0 : index
    %c0_4 = arith.constant 0 : index
    %4 = vector.load %arg3[%c0_3, %c0_4] : memref<128x1xf32, #tpu.memory_space<vmem>>, vector<128x1xf32>
    %5 = vector.broadcast %4 : vector<128x1xf32> to vector<128x128xf32>
    %6 = arith.addf %3, %5 : vector<128x128xf32>
    %cst_5 = arith.constant 0.000000e+00 : f32
    %7 = vector.broadcast %cst_5 : f32 to vector<128x128xf32>
    %8 = arith.maximumf %6, %7 : vector<128x128xf32>
    %c0_6 = arith.constant 0 : index
    %c0_7 = arith.constant 0 : index
    %9 = vector.load %arg4[%c0_6, %c0_7] : memref<128x128xbf16, #tpu.memory_space<vmem>>, vector<128x128xbf16>
    %10 = arith.truncf %8 : vector<128x128xf32> to vector<128x128xbf16>
    %cst_8 = arith.constant dense<0.000000e+00> : vector<128x128xf32>
    %11 = tpu.matmul %9, %10, %cst_8 {dimension_numbers = #tpu.dot_dimension_numbers<[1], [0], [0], [1], [0, 0, 1, 1], [], []>} : vector<128x128xbf16>, vector<128x128xbf16>, vector<128x128xf32> -> vector<128x128xf32>
    %c0_9 = arith.constant 0 : index
    %c0_10 = arith.constant 0 : index
    %12 = vector.load %arg5[%c0_9, %c0_10] : memref<128x1xf32, #tpu.memory_space<vmem>>, vector<128x1xf32>
    %13 = vector.broadcast %12 : vector<128x1xf32> to vector<128x128xf32>
    %14 = arith.addf %11, %13 : vector<128x128xf32>
    %cst_11 = arith.constant 0.000000e+00 : f32
    %15 = vector.broadcast %cst_11 : f32 to vector<128x128xf32>
    %16 = arith.maximumf %14, %15 : vector<128x128xf32>
    %c0_12 = arith.constant 0 : index
    %c0_13 = arith.constant 0 : index
    %17 = vector.load %arg6[%c0_12, %c0_13] : memref<64x128xbf16, #tpu.memory_space<vmem>>, vector<64x128xbf16>
    %18 = arith.truncf %16 : vector<128x128xf32> to vector<128x128xbf16>
    %cst_14 = arith.constant dense<0.000000e+00> : vector<64x128xf32>
    %19 = tpu.matmul %17, %18, %cst_14 {dimension_numbers = #tpu.dot_dimension_numbers<[1], [0], [0], [1], [0, 0, 1, 1], [], []>} : vector<64x128xbf16>, vector<128x128xbf16>, vector<64x128xf32> -> vector<64x128xf32>
    %c0_15 = arith.constant 0 : index
    %c0_16 = arith.constant 0 : index
    %20 = vector.load %arg7[%c0_15, %c0_16] : memref<64x1xf32, #tpu.memory_space<vmem>>, vector<64x1xf32>
    %21 = vector.broadcast %20 : vector<64x1xf32> to vector<64x128xf32>
    %22 = arith.addf %19, %21 : vector<64x128xf32>
    %cst_17 = arith.constant 0.000000e+00 : f32
    %23 = vector.broadcast %cst_17 : f32 to vector<64x128xf32>
    %24 = arith.maximumf %22, %23 : vector<64x128xf32>
    %c0_18 = arith.constant 0 : index
    %c0_19 = arith.constant 0 : index
    %25 = vector.load %arg8[%c0_18, %c0_19] : memref<1x64xbf16, #tpu.memory_space<vmem>>, vector<1x64xbf16>
    %26 = arith.truncf %24 : vector<64x128xf32> to vector<64x128xbf16>
    %cst_20 = arith.constant dense<0.000000e+00> : vector<1x128xf32>
    %27 = tpu.matmul %25, %26, %cst_20 {dimension_numbers = #tpu.dot_dimension_numbers<[1], [0], [0], [1], [0, 0, 1, 1], [], []>} : vector<1x64xbf16>, vector<64x128xbf16>, vector<1x128xf32> -> vector<1x128xf32>
    %c0_21 = arith.constant 0 : index
    %c0_22 = arith.constant 0 : index
    %28 = vector.load %arg9[%c0_21, %c0_22] : memref<1x1xf32, #tpu.memory_space<vmem>>, vector<1x1xf32>
    %29 = vector.broadcast %28 : vector<1x1xf32> to vector<1x128xf32>
    %30 = arith.addf %27, %29 : vector<1x128xf32>
    %31 = arith.negf %30 : vector<1x128xf32>
    %32 = math.exp %31 : vector<1x128xf32>
    %cst_23 = arith.constant 1.000000e+00 : f32
    %33 = vector.broadcast %cst_23 : f32 to vector<1x128xf32>
    %34 = arith.addf %33, %32 : vector<1x128xf32>
    %35 = arith.divf %33, %34 : vector<1x128xf32>
    %36 = vector.shape_cast %35 : vector<1x128xf32> to vector<1x1x128xf32>
    %c0_24 = arith.constant 0 : index
    %c0_25 = arith.constant 0 : index
    %c0_26 = arith.constant 0 : index
    %37 = vector.load %arg10[%c0_24, %c0_25, %c0_26] : memref<1x1x128xf32, #tpu.memory_space<vmem>>, vector<1x1x128xf32>
    tpu.vector_store %arg10[%c0_24, %c0_25, %c0_26], %36 {strides = array<i32>} : memref<1x1x128xf32, #tpu.memory_space<vmem>>, vector<1x1x128xf32>,
    return
  }
  func.func @transform_0(%arg0: i32) -> (i32, i32) {
    %c0_i32 = arith.constant 0 : i32
    %c0_i32_0 = arith.constant 0 : i32
    return %c0_i32, %arg0 : i32, i32
  }
  func.func @transform_1(%arg0: i32) -> (i32, i32) {
    %c0_i32 = arith.constant 0 : i32
    %c0_i32_0 = arith.constant 0 : i32
    %c0_i32_1 = arith.constant 0 : i32
    return %c0_i32, %c0_i32_0 : i32, i32
  }
  func.func @transform_2(%arg0: i32) -> (i32, i32) {
    %c0_i32 = arith.constant 0 : i32
    %c0_i32_0 = arith.constant 0 : i32
    %c0_i32_1 = arith.constant 0 : i32
    return %c0_i32, %c0_i32_0 : i32, i32
  }
  func.func @transform_3(%arg0: i32) -> (i32, i32) {
    %c0_i32 = arith.constant 0 : i32
    %c0_i32_0 = arith.constant 0 : i32
    %c0_i32_1 = arith.constant 0 : i32
    return %c0_i32, %c0_i32_0 : i32, i32
  }
  func.func @transform_4(%arg0: i32) -> (i32, i32) {
    %c0_i32 = arith.constant 0 : i32
    %c0_i32_0 = arith.constant 0 : i32
    %c0_i32_1 = arith.constant 0 : i32
    return %c0_i32, %c0_i32_0 : i32, i32
  }
  func.func @transform_5(%arg0: i32) -> (i32, i32) {
    %c0_i32 = arith.constant 0 : i32
    %c0_i32_0 = arith.constant 0 : i32
    %c0_i32_1 = arith.constant 0 : i32
    return %c0_i32, %c0_i32_0 : i32, i32
  }
  func.func @transform_6(%arg0: i32) -> (i32, i32) {
    %c0_i32 = arith.constant 0 : i32
    %c0_i32_0 = arith.constant 0 : i32
    %c0_i32_1 = arith.constant 0 : i32
    return %c0_i32, %c0_i32_0 : i32, i32
  }
  func.func @transform_7(%arg0: i32) -> (i32, i32) {
    %c0_i32 = arith.constant 0 : i32
    %c0_i32_0 = arith.constant 0 : i32
    %c0_i32_1 = arith.constant 0 : i32
    return %c0_i32, %c0_i32_0 : i32, i32
  }
  func.func @transform_8(%arg0: i32) -> (i32, i32) {
    %c0_i32 = arith.constant 0 : i32
    %c0_i32_0 = arith.constant 0 : i32
    %c0_i32_1 = arith.constant 0 : i32
    return %c0_i32, %c0_i32_0 : i32, i32
  }
  func.func @transform_9(%arg0: i32) -> (i32, i32, i32) {
    %c0_i32 = arith.constant 0 : i32
    %c0_i32_0 = arith.constant 0 : i32
    %c0_i32_1 = arith.constant 0 : i32
    return %arg0, %c0_i32, %c0_i32_0 : i32, i32, i32
  }
}

</mosaic_0001>

<bundles_post_ra>
// kernel: lmodel_forward.1
= control target key start
LH: loop header
LB: loop body
LE: loop exit
PB: predicated region body
PF: predicated region fallthrough
CT: control target
= control target key end

     0   :  { %v820_v0 = vmov 0   ;;  %vm214_vm0 = vcmask 1043456   ;;  %vm189_vm1 = vcmask 64512   ;;  %vm653_vm2 = vcmask 523264   ;;  %s1074_s2 = inlined_call_operand.vmem [shape: f32[128,1], index: 2, kind: input, shape index: {}]   ;;  %s1075_s0 = inlined_call_operand.vmem [shape: f32[8,128], index: 0, kind: input, shape index: {}]   ;;  %s1076_s1 = inlined_call_operand.vmem [shape: bf16[128,8], index: 1, kind: input, shape index: {}]   ;;  %s1077_s4 = inlined_call_operand.vmem [shape: f32[128,1], index: 4, kind: input, shape index: {}]   ;;  %s1078_s6 = inlined_call_operand.vmem [shape: f32[64,1], index: 6, kind: input, shape index: {}]   ;;  %s1079_s8 = inlined_call_operand.<no memory space> [shape: f32[1,1], index: 8, kind: input, shape index: {}]   ;;  %s1080_s3 = inlined_call_operand.vmem [shape: bf16[128,128], index: 3, kind: input, shape index: {}]   ;;  %s1081_s5 = inlined_call_operand.vmem [shape: bf16[64,128], index: 5, kind: input, shape index: {}]   ;;  %s1082_s7 = inlined_call_operand.vmem [shape: bf16[1,64], index: 7, kind: input, shape index: {}]   ;;  %s1083_s9 = inlined_call_operand.vmem [shape: f32[1,1,128], index: 9, kind: output, shape index: {}]  }
   0x1   :  { %813 = vset.pattern.permute.xlu0 %v820_v0  ;;  %v67_v1 = vld [vmem:[%s1074_s2 + $0x70] sm:$0xff]  ;;  %v35_v2 = vld [vmem:[%s1075_s0] sm:$0xff]  ;;  %815 = vset.pattern.permute.xlu2 %v820_v0  ;;  %v68_v8 = vld [vmem:[%s1074_s2 + $0x78] sm:$0xff]  ;;  %v14_v42 = vstv %s1079_s8 }
   0x2   :  { %141 = vperm.xlu0 %813, %v67_v1   ;;  %v36_v3 = vpack.c.bf16 %v35_v2, %v35_v2  ;;  %814 = vset.pattern.permute.xlu1 %v820_v0  ;;  %v65_v4 = vld [vmem:[%s1074_s2 + $0x60] sm:$0xff]  ;;  %v63_v5 = vld [vmem:[%s1074_s2 + $0x50] sm:$0xff]  ;;  %v66_v9 = vld [vmem:[%s1074_s2 + $0x68] sm:$0xff]  ;;  %15 = vst [vmem:[#allocation2] sm:$0x1] %v14_v42 }
   0x3   :  { %131 = vperm.xlu1 %814, %v65_v4   ;;  %121 = vperm.xlu2 %815, %v63_v5   ;;  %v784_v7 = vld [vmem:[%s1076_s1] sm:$0xff]  ;;  %v64_v10 = vld [vmem:[%s1074_s2 + $0x58] sm:$0xff]  ;;  %v62_v12 = vld [vmem:[%s1074_s2 + $0x48] sm:$0xff] }
   0x4   :  { %v216_v6 = vsel %vm214_vm0, %v36_v3, 0  ;;  %v61_v11 = vld [vmem:[%s1074_s2 + $0x40] sm:$0xff]  ;;  %v59_v13 = vld [vmem:[%s1074_s2 + $0x30] sm:$0xff]  ;;  %v785_v14 = vld [vmem:[%s1076_s1 + $0x8] sm:$0xff] }
   0x5   :  { %225 = vmatpush.bf16.msra.mxu0 %v216_v6  ;;  %v60_v15 = vld [vmem:[%s1074_s2 + $0x38] sm:$0xff]  ;;  %v58_v16 = vld [vmem:[%s1074_s2 + $0x28] sm:$0xff]  ;;  %v57_v17 = vld [vmem:[%s1074_s2 + $0x20] sm:$0xff] }
   0x6   :  { %v55_v18 = vld [vmem:[%s1074_s2 + $0x10] sm:$0xff]  ;;  %v56_v19 = vld [vmem:[%s1074_s2 + $0x18] sm:$0xff]  ;;  %v53_v20 = vld [vmem:[%s1074_s2] sm:$0xff] }
   0x7   :  { %v786_v21 = vld [vmem:[%s1076_s1 + $0x10] sm:$0xff]  ;;  %v54_v22 = vld [vmem:[%s1074_s2 + $0x8] sm:$0xff]  ;;  %v319_v24 = vld [vmem:[%s1077_s4 + $0x60] sm:$0xff] }
   0x8   :  { %726 = vmatmul.msk.bf16.vlgmr.msra.gmra.mxu0 %vm189_vm1, %v784_v7  ;;  %v321_v23 = vld [vmem:[%s1077_s4 + $0x70] sm:$0xff]  ;;  %v320_v25 = vld [vmem:[%s1077_s4 + $0x68] sm:$0xff]  ;;  %v787_v26 = vld [vmem:[%s1076_s1 + $0x18] sm:$0xff] }
   0x9   :  { %v318_v27 = vld [vmem:[%s1077_s4 + $0x58] sm:$0xff]  ;;  %v315_v28 = vld [vmem:[%s1077_s4 + $0x40] sm:$0xff]  ;;  %v313_v30 = vld [vmem:[%s1077_s4 + $0x30] sm:$0xff] }
   0xa   :  { %146 = vperm.xlu0 %813, %v68_v8   ;;  %v322_v29 = vld [vmem:[%s1077_s4 + $0x78] sm:$0xff]  ;;  %v788_v32 = vld [vmem:[%s1076_s1 + $0x20] sm:$0xff]  ;;  %v312_v33 = vld [vmem:[%s1077_s4 + $0x28] sm:$0xff] }
   0xb   :  { %136 = vperm.xlu1 %814, %v66_v9   ;;  %126 = vperm.xlu2 %815, %v64_v10   ;;  %v314_v31 = vld [vmem:[%s1077_s4 + $0x38] sm:$0xff]  ;;  %v309_v34 = vld [vmem:[%s1077_s4 + $0x10] sm:$0xff]  ;;  %v307_v36 = vld [vmem:[%s1077_s4] sm:$0xff] }
   0xc   :  { %v317_v35 = vld [vmem:[%s1077_s4 + $0x50] sm:$0xff]  ;;  %v308_v37 = vld [vmem:[%s1077_s4 + $0x8] sm:$0xff]  ;;  %v539_v40 = vld [vmem:[%s1078_s6 + $0x38] sm:$0xff] }
   0xd   :  { %v789_v38 = vld [vmem:[%s1076_s1 + $0x28] sm:$0xff]  ;;  %v536_v41 = vld [vmem:[%s1078_s6 + $0x20] sm:$0xff]  ;;  %v534_v44 = vld [vmem:[%s1078_s6 + $0x10] sm:$0xff] }
   0xe   :  { %v316_v39 = vld [vmem:[%s1077_s4 + $0x48] sm:$0xff]  ;;  %v311_v43 = vld [vmem:[%s1077_s4 + $0x20] sm:$0xff]  ;;  %v535_v45 = vld [vmem:[%s1078_s6 + $0x18] sm:$0xff] }
   0xf   :  { %v790_v46 = vld [vmem:[%s1076_s1 + $0x30] sm:$0xff]  ;;  %v310_v47 = vld [vmem:[%s1077_s4 + $0x18] sm:$0xff]  ;;  %v533_v48 = vld [vmem:[%s1078_s6 + $0x8] sm:$0xff] }
  0x10   :  { %v646_v49 = vld [vmem:[#allocation2] sm:$0x1]  ;;  %v538_v50 = vld [vmem:[%s1078_s6 + $0x30] sm:$0xff]  ;;  %v791_v53 = vld [vmem:[%s1076_s1 + $0x38] sm:$0xff] }
  0x11   :  { %v537_v55 = vld [vmem:[%s1078_s6 + $0x28] sm:$0xff]  ;;  %v532_v59 = vld [vmem:[%s1078_s6] sm:$0xff] }
  0x12   :  { %111 = vperm.xlu0 %813, %v61_v11  }
  0x13   :  { %116 = vperm.xlu1 %814, %v62_v12   ;;  %101 = vperm.xlu2 %815, %v59_v13  }
  0x18   :  { %727 = vmatmul.msk.bf16.gmra.mxu0 %vm189_vm1, %v785_v14 }
  0x1a   :  { %106 = vperm.xlu0 %813, %v60_v15  }
  0x1b   :  { %96 = vperm.xlu2 %815, %v58_v16   ;;  %91 = vperm.xlu1 %814, %v57_v17  }
  0x22   :  { %81 = vperm.xlu0 %813, %v55_v18  }
  0x23   :  { %86 = vperm.xlu1 %814, %v56_v19   ;;  %71 = vperm.xlu2 %815, %v53_v20  }
  0x28   :  { %728 = vmatmul.msk.bf16.gmra.mxu0 %vm189_vm1, %v786_v21 }
  0x2a   :  { %76 = vperm.xlu0 %813, %v54_v22  }
  0x2b   :  { %395 = vperm.xlu1 %814, %v321_v23   ;;  %400 = vperm.xlu2 %815, %v322_v29  }
  0x32   :  { %385 = vperm.xlu0 %813, %v319_v24  }
  0x33   :  { %390 = vperm.xlu1 %814, %v320_v25   ;;  %375 = vperm.xlu2 %815, %v317_v35  }
  0x38   :  { %729 = vmatmul.msk.bf16.gmra.mxu0 %vm189_vm1, %v787_v26 }
  0x3a   :  { %380 = vperm.xlu0 %813, %v318_v27  }
  0x3b   :  { %365 = vperm.xlu1 %814, %v315_v28   ;;  %370 = vperm.xlu2 %815, %v316_v39  }
  0x42   :  { %355 = vperm.xlu0 %813, %v313_v30  }
  0x43   :  { %360 = vperm.xlu1 %814, %v314_v31   ;;  %345 = vperm.xlu2 %815, %v311_v43  }
  0x48   :  { %730 = vmatmul.msk.bf16.gmra.mxu0 %vm189_vm1, %v788_v32 }
  0x4a   :  { %350 = vperm.xlu0 %813, %v312_v33  }
  0x4b   :  { %335 = vperm.xlu1 %814, %v309_v34   ;;  %340 = vperm.xlu2 %815, %v310_v47  }
  0x52   :  { %325 = vperm.xlu0 %813, %v307_v36  }
  0x53   :  { %330 = vperm.xlu1 %814, %v308_v37   ;;  %572 = vperm.xlu2 %815, %v538_v50  }
  0x58   :  { %731 = vmatmul.msk.bf16.gmra.mxu0 %vm189_vm1, %v789_v38 }
  0x5a   :  { %577 = vperm.xlu0 %813, %v539_v40  }
  0x5b   :  { %562 = vperm.xlu1 %814, %v536_v41   ;;  %567 = vperm.xlu2 %815, %v537_v55  }
  0x5d   :  { %v1019_v51 = vpop.permute.xlu2 %121 }
  0x62   :  { %552 = vperm.xlu0 %813, %v534_v44  }
  0x63   :  { %557 = vperm.xlu1 %814, %v535_v45   ;;  %542 = vperm.xlu2 %815, %v532_v59  }
  0x65   :  { %v127_v56 = vpop.permute.xlu2 %126 }
  0x68   :  { %732 = vmatmul.msk.bf16.gmra.mxu0 %vm189_vm1, %v790_v46 }
  0x6a   :  { %547 = vperm.xlu0 %813, %v533_v48  }
  0x6b   :  { %649 = vperm.xlu1 %814, %v646_v49  }
  0x6d   :  { %v102_v60 = vpop.permute.xlu2 %101 }
  0x74   :  { %v142_v52 = vpop.permute.xlu0 %141 }
  0x75   :  { %v132_v54 = vpop.permute.xlu1 %131  ;;  %v97_v2 = vpop.permute.xlu2 %96 }
  0x78   :  { %733 = vmatmul.msk.bf16.gmra.mxu0 %vm189_vm1, %v791_v53 }
  0x7c   :  { %v147_v57 = vpop.permute.xlu0 %146 }
  0x7d   :  { %v137_v58 = vpop.permute.xlu1 %136  ;;  %v72_v6 = vpop.permute.xlu2 %71 }
  0x84   :  { %v112_v61 = vpop.permute.xlu0 %111 }
  0x85   :  { %v227_v62 = vpop.f32.mrf.mxu0  ;;  %v117_v63 = vpop.permute.xlu1 %116 }
  0x86   :  { %v228_v7 = vadd.f32 %v227_v62, %v72_v6 }
  0x88   :  { %v267_v14 = vmax.f32 %v228_v7, 0.0 }
  0x8c   :  { %v107_v0 = vpop.permute.xlu0 %106 }
  0x8d   :  { %v229_v1 = vpop.f32.mrf.mxu0  ;;  %v92_v3 = vpop.permute.xlu1 %91 }
  0x94   :  { %v82_v4 = vpop.permute.xlu0 %81 }
  0x95   :  { %v232_v5 = vpop.f32.mrf.mxu0  ;;  %v87_v8 = vpop.permute.xlu1 %86 }
  0x96   :  { %v233_v9 = vadd.f32 %v232_v5, %v82_v4  ;;  %v795_v4 = vld [vmem:[%s1080_s3 + $0x18] sm:$0xff]  ;;  %v796_v5 = vld [vmem:[%s1080_s3 + $0x20] sm:$0xff] }
  0x98   :  { %v269_v16 = vmax.f32 %v233_v9, 0.0 }
  0x9c   :  { %v77_v10 = vpop.permute.xlu0 %76 }
  0x9d   :  { %v230_v11 = vadd.f32 %v229_v1, %v77_v10  ;;  %v234_v12 = vpop.f32.mrf.mxu0  ;;  %v396_v6 = vpop.permute.xlu1 %395 }
  0x9e   :  { %v235_v13 = vadd.f32 %v234_v12, %v87_v8 }
  0x9f   :  { %v268_v15 = vmax.f32 %v230_v11, 0.0 }
  0xa0   :  { %v270_v17 = vmax.f32 %v235_v13, 0.0 }
  0xa1   :  { %v299_v18 = vpack.c.bf16 %v268_v15, %v267_v14 }
  0xa2   :  { %v300_v19 = vpack.c.bf16 %v270_v17, %v269_v16 }
  0xa4   :  { %v386_v7 = vpop.permute.xlu0 %385 }
  0xa5   :  { %v237_v20 = vpop.f32.mrf.mxu0  ;;  %v391_v8 = vpop.permute.xlu1 %390 }
  0xa6   :  { %v238_v21 = vadd.f32 %v237_v20, %v92_v3  ;;  %v799_v3 = vld [vmem:[%s1080_s3 + $0x38] sm:$0xff] }
  0xa8   :  { %v271_v24 = vmax.f32 %v238_v21, 0.0 }
  0xac   :  { %v381_v9 = vpop.permute.xlu0 %380 }
  0xad   :  { %v239_v22 = vpop.f32.mrf.mxu0  ;;  %v366_v10 = vpop.permute.xlu1 %365 }
  0xae   :  { %v240_v23 = vadd.f32 %v239_v22, %v97_v2  ;;  %v794_v2 = vld [vmem:[%s1080_s3 + $0x10] sm:$0xff] }
  0xb0   :  { %v272_v25 = vmax.f32 %v240_v23, 0.0 }
  0xb2   :  { %v301_v26 = vpack.c.bf16 %v272_v25, %v271_v24 }
  0xb4   :  { %v356_v11 = vpop.permute.xlu0 %355 }
  0xb5   :  { %v242_v27 = vpop.f32.mrf.mxu0  ;;  %v361_v12 = vpop.permute.xlu1 %360 }
  0xb6   :  { %v243_v28 = vadd.f32 %v242_v27, %v102_v60 }
  0xb8   :  { %v273_v31 = vmax.f32 %v243_v28, 0.0 }
  0xbc   :  { %v351_v13 = vpop.permute.xlu0 %350 }
  0xbd   :  { %v244_v29 = vpop.f32.mrf.mxu0  ;;  %v336_v14 = vpop.permute.xlu1 %335 }
  0xbe   :  { %v245_v30 = vadd.f32 %v244_v29, %v107_v0 }
  0xc0   :  { %v274_v32 = vmax.f32 %v245_v30, 0.0 }
  0xc2   :  { %v302_v33 = vpack.c.bf16 %v274_v32, %v273_v31  ;;  %v401_v32 = vpop.permute.xlu2 %400 }
  0xc4   :  { %v326_v16 = vpop.permute.xlu0 %325 }
  0xc5   :  { %v247_v34 = vpop.f32.mrf.mxu0 }
  0xc6   :  { %v248_v0 = vadd.f32 %v247_v34, %v112_v61  ;;  %v793_v61 = vld [vmem:[%s1080_s3 + $0x8] sm:$0xff] }
  0xcd   :  { %v249_v35 = vpop.f32.mrf.mxu0 }
  0xce   :  { %v250_v59 = vadd.f32 %v249_v35, %v117_v63  ;;  %v798_v63 = vld [vmem:[%s1080_s3 + $0x30] sm:$0xff] }
  0xd5   :  { %v252_v36 = vpop.f32.mrf.mxu0 }
  0xd6   :  { %v253_v53 = vadd.f32 %v252_v36, %v1019_v51  ;;  %v792_v51 = vld [vmem:[%s1080_s3] sm:$0xff] }
  0xd8   :  { %v277_v1 = vmax.f32 %v253_v53, 0.0 }
  0xdd   :  { %v254_v37 = vpop.f32.mrf.mxu0 }
  0xde   :  { %v255_v48 = vadd.f32 %v254_v37, %v127_v56 }
  0xe0   :  { %v278_v60 = vmax.f32 %v255_v48, 0.0 }
  0xe5   :  { %v257_v38 = vpop.f32.mrf.mxu0 }
  0xe6   :  { %v258_v45 = vadd.f32 %v257_v38, %v132_v54  ;;  %v275_v54 = vmax.f32 %v248_v0, 0.0 }
  0xe8   :  { %v279_v55 = vmax.f32 %v258_v45, 0.0 }
  0xed   :  { %v259_v39 = vpop.f32.mrf.mxu0 }
  0xee   :  { %v260_v43 = vadd.f32 %v259_v39, %v137_v58  ;;  %v797_v58 = vld [vmem:[%s1080_s3 + $0x28] sm:$0xff] }
  0xf0   :  { %v280_v49 = vmax.f32 %v260_v43, 0.0 }
  0xf2   :  { %v305_v62 = vpack.c.bf16 %v280_v49, %v279_v55 }
  0xf5   :  { %v262_v40 = vpop.f32.mrf.mxu0 }
  0xf6   :  { %v263_v41 = vadd.f32 %v262_v40, %v142_v52  ;;  %v276_v52 = vmax.f32 %v250_v59, 0.0 }
  0xf8   :  { %v281_v46 = vmax.f32 %v263_v41, 0.0  ;;  %v303_v56 = vpack.c.bf16 %v276_v52, %v275_v54 }
  0xfd   :  { %v264_v42 = vpop.f32.mrf.mxu0 }
  0xfe   :  { %v265_v44 = vadd.f32 %v264_v42, %v147_v57  ;;  %v304_v57 = vpack.c.bf16 %v278_v60, %v277_v1  ;;  %v376_v42 = vpop.permute.xlu2 %375 }
 0x100   :  { %v282_v47 = vmax.f32 %v265_v44, 0.0 }
 0x102   :  { %v306_v50 = vpack.c.bf16 %v282_v47, %v281_v46 }
 0x104   :  { %451 = vmatpush.bf16.msra.mxu1 %v306_v50  ;;  %804 = vmatpush.bf16.msra.mxu3 %v306_v50 }
 0x106   :  { %v371_v59 = vpop.permute.xlu2 %370 }
 0x108   :  { %452 = vmatpush.bf16.msra.mxu1 %v305_v62  ;;  %805 = vmatpush.bf16.msra.mxu3 %v305_v62 }
 0x10c   :  { %453 = vmatpush.bf16.msra.mxu1 %v304_v57  ;;  %806 = vmatpush.bf16.msra.mxu3 %v304_v57 }
 0x10e   :  { %v346_v62 = vpop.permute.xlu2 %345 }
 0x110   :  { %454 = vmatpush.bf16.msra.mxu1 %v303_v56  ;;  %807 = vmatpush.bf16.msra.mxu3 %v303_v56 }
 0x114   :  { %455 = vmatpush.bf16.msra.mxu1 %v302_v33  ;;  %808 = vmatpush.bf16.msra.mxu3 %v302_v33 }
 0x118   :  { %456 = vmatpush.bf16.msra.mxu1 %v301_v26  ;;  %809 = vmatpush.bf16.msra.mxu3 %v301_v26 }
 0x11c   :  { %457 = vmatpush.bf16.msra.mxu1 %v300_v19  ;;  %810 = vmatpush.bf16.msra.mxu3 %v300_v19  ;;  %v331_v19 = vpop.permute.xlu1 %330 }
 0x120   :  { %458 = vmatpush.bf16.msra.mxu1 %v299_v18  ;;  %811 = vmatpush.bf16.msra.mxu3 %v299_v18 }
 0x123   :  { %459 = vmatmul.bf16.vlgmr.msra.gmra.mxu1 %v792_v51  ;;  %484 = vmatmul.bf16.vlgmr.msra.gmra.mxu3 %v797_v58 }
 0x133   :  { %464 = vmatmul.bf16.gmra.mxu1 %v793_v61  ;;  %489 = vmatmul.bf16.gmra.mxu3 %v798_v63 }
 0x143   :  { %469 = vmatmul.bf16.gmra.mxu1 %v794_v2  ;;  %494 = vmatmul.bf16.gmra.mxu3 %v799_v3 }
 0x153   :  { %474 = vmatmul.bf16.gmra.mxu1 %v795_v4  ;;  %v341_v4 = vpop.permute.xlu2 %340 }
 0x163   :  { %479 = vmatmul.bf16.gmra.mxu1 %v796_v5 }
 0x1a0   :  { %v460_v15 = vpop.f32.mrf.mxu1 }
 0x1a1   :  { %v461_v18 = vadd.f32 %v460_v15, %v326_v16  ;;  %v801_v16 = vld [vmem:[%s1081_s5 + $0x8] sm:$0xff] }
 0x1a3   :  { %v500_v22 = vmax.f32 %v461_v18, 0.0 }
 0x1a6   :  { %v485_v17 = vpop.f32.mrf.mxu3 }
 0x1a7   :  { %v486_v46 = vadd.f32 %v485_v17, %v376_v42  ;;  %v803_v17 = vld [vmem:[%s1081_s5 + $0x18] sm:$0xff] }
 0x1a8   :  { %v462_v20 = vpop.f32.mrf.mxu1 }
 0x1a9   :  { %v463_v21 = vadd.f32 %v462_v20, %v331_v19  ;;  %v510_v53 = vmax.f32 %v486_v46, 0.0 }
 0x1ab   :  { %v501_v23 = vmax.f32 %v463_v21, 0.0 }
 0x1ad   :  { %v524_v24 = vpack.c.bf16 %v501_v23, %v500_v22 }
 0x1ae   :  { %v487_v25 = vpop.f32.mrf.mxu3 }
 0x1af   :  { %v488_v43 = vadd.f32 %v487_v25, %v381_v9  ;;  %v573_v25 = vpop.permute.xlu2 %572 }
 0x1b0   :  { %v465_v26 = vpop.f32.mrf.mxu1 }
 0x1b1   :  { %v511_v48 = vmax.f32 %v488_v43, 0.0 }
 0x1b3   :  { %v529_v55 = vpack.c.bf16 %v511_v48, %v510_v53 }
 0x1b6   :  { %v490_v27 = vpop.f32.mrf.mxu3 }
 0x1b7   :  { %v491_v39 = vadd.f32 %v490_v27, %v386_v7  ;;  %v563_v27 = vpop.permute.xlu1 %562 }
 0x1b8   :  { %v467_v28 = vpop.f32.mrf.mxu1 }
 0x1b9   :  { %v512_v47 = vmax.f32 %v491_v39, 0.0  ;;  %v468_v5 = vadd.f32 %v467_v28, %v341_v4 }
 0x1be   :  { %v492_v29 = vpop.f32.mrf.mxu3 }
 0x1bf   :  { %v493_v36 = vadd.f32 %v492_v29, %v391_v8  ;;  %v466_v8 = vadd.f32 %v465_v26, %v336_v14  ;;  %v802_v14 = vld [vmem:[%s1081_s5 + $0x10] sm:$0xff] }
 0x1c0   :  { %v470_v30 = vpop.f32.mrf.mxu1 }
 0x1c1   :  { %v513_v44 = vmax.f32 %v493_v36, 0.0  ;;  %v471_v2 = vadd.f32 %v470_v30, %v346_v62  ;;  %v568_v30 = vpop.permute.xlu2 %567 }
 0x1c3   :  { %v530_v49 = vpack.c.bf16 %v513_v44, %v512_v47  ;;  %v504_v9 = vmax.f32 %v471_v2, 0.0 }
 0x1c6   :  { %v495_v31 = vpop.f32.mrf.mxu3 }
 0x1c7   :  { %v496_v34 = vadd.f32 %v495_v31, %v396_v6 }
 0x1c8   :  { %v472_v33 = vpop.f32.mrf.mxu1 }
 0x1c9   :  { %v514_v40 = vmax.f32 %v496_v34, 0.0  ;;  %v473_v58 = vadd.f32 %v472_v33, %v351_v13  ;;  %v800_v13 = vld [vmem:[%s1081_s5] sm:$0xff]  ;;  %v543_v47 = vpop.permute.xlu2 %542 }
 0x1cb   :  { %v505_v6 = vmax.f32 %v473_v58, 0.0 }
 0x1cd   :  { %v526_v15 = vpack.c.bf16 %v505_v6, %v504_v9 }
 0x1ce   :  { %v497_v35 = vpop.f32.mrf.mxu3 }
 0x1cf   :  { %v498_v37 = vadd.f32 %v497_v35, %v401_v32 }
 0x1d0   :  { %v475_v38 = vpop.f32.mrf.mxu1 }
 0x1d1   :  { %v515_v41 = vmax.f32 %v498_v37, 0.0  ;;  %v476_v54 = vadd.f32 %v475_v38, %v356_v11  ;;  %v558_v37 = vpop.permute.xlu1 %557 }
 0x1d3   :  { %v531_v45 = vpack.c.bf16 %v515_v41, %v514_v40  ;;  %v506_v3 = vmax.f32 %v476_v54, 0.0 }
 0x1d5   :  { %604 = vmatpush.bf16.msra.mxu2 %v531_v45 }
 0x1d8   :  { %v477_v50 = vpop.f32.mrf.mxu1 }
 0x1d9   :  { %605 = vmatpush.bf16.msra.mxu2 %v530_v49  ;;  %v478_v52 = vadd.f32 %v477_v50, %v361_v12  ;;  %v502_v12 = vmax.f32 %v466_v8, 0.0  ;;  %v650_v62 = vpop.permute.xlu1 %649 }
 0x1db   :  { %v507_v61 = vmax.f32 %v478_v52, 0.0 }
 0x1dd   :  { %606 = vmatpush.bf16.msra.mxu2 %v529_v55  ;;  %v527_v7 = vpack.c.bf16 %v507_v61, %v506_v3 }
 0x1e0   :  { %v480_v60 = vpop.f32.mrf.mxu1 }
 0x1e1   :  { %v481_v0 = vadd.f32 %v480_v60, %v366_v10  ;;  %v503_v10 = vmax.f32 %v468_v5, 0.0  ;;  %v641_v60 = vld [vmem:[%s1082_s7] sm:$0x1] }
 0x1e3   :  { %v508_v56 = vmax.f32 %v481_v0, 0.0  ;;  %v525_v11 = vpack.c.bf16 %v503_v10, %v502_v12  ;;  %v652_v0 = vperm.slane %v650_v62, 0 }
 0x1e8   :  { %v482_v1 = vpop.f32.mrf.mxu1 }
 0x1e9   :  { %v483_v57 = vadd.f32 %v482_v1, %v371_v59 }
 0x1eb   :  { %v509_v51 = vmax.f32 %v483_v57, 0.0 }
 0x1ed   :  { %v528_v63 = vpack.c.bf16 %v509_v51, %v508_v56 }
 0x1ef   :  { %607 = vmatpush.bf16.msra.mxu2 %v528_v63 }
 0x1f3   :  { %608 = vmatpush.bf16.msra.mxu2 %v527_v7 }
 0x1f7   :  { %609 = vmatpush.bf16.msra.mxu2 %v526_v15 }
 0x1fb   :  { %610 = vmatpush.bf16.msra.mxu2 %v525_v11 }
 0x1ff   :  { %611 = vmatpush.bf16.msra.mxu2 %v524_v24  ;;  %v578_v24 = vpop.permute.xlu0 %577 }
 0x202   :  { %612 = vmatmul.bf16.vlgmr.msra.gmra.mxu2 %v800_v13 }
 0x207   :  { %v553_v28 = vpop.permute.xlu0 %552 }
 0x20f   :  { %v548_v43 = vpop.permute.xlu0 %547 }
 0x212   :  { %617 = vmatmul.bf16.gmra.mxu2 %v801_v16 }
 0x222   :  { %622 = vmatmul.bf16.gmra.mxu2 %v802_v14 }
 0x232   :  { %627 = vmatmul.bf16.gmra.mxu2 %v803_v17 }
 0x285   :  { %v613_v18 = vpop.f32.mrf.mxu2 }
 0x286   :  { %v614_v48 = vadd.f32 %v613_v18, %v543_v47 }
 0x288   :  { %v633_v55 = vmax.f32 %v614_v48, 0.0 }
 0x28d   :  { %v615_v19 = vpop.f32.mrf.mxu2 }
 0x28e   :  { %v616_v44 = vadd.f32 %v615_v19, %v548_v43 }
 0x290   :  { %v634_v50 = vmax.f32 %v616_v44, 0.0 }
 0x292   :  { %v642_v59 = vpack.c.bf16 %v634_v50, %v633_v55 }
 0x295   :  { %v618_v20 = vpop.f32.mrf.mxu2 }
 0x296   :  { %v619_v41 = vadd.f32 %v618_v20, %v553_v28 }
 0x298   :  { %v635_v49 = vmax.f32 %v619_v41, 0.0 }
 0x29d   :  { %v620_v21 = vpop.f32.mrf.mxu2 }
 0x29e   :  { %v621_v38 = vadd.f32 %v620_v21, %v558_v37 }
 0x2a0   :  { %v636_v45 = vmax.f32 %v621_v38, 0.0 }
 0x2a2   :  { %v643_v53 = vpack.c.bf16 %v636_v45, %v635_v49 }
 0x2a5   :  { %v623_v22 = vpop.f32.mrf.mxu2 }
 0x2a6   :  { %v624_v34 = vadd.f32 %v623_v22, %v563_v27 }
 0x2a8   :  { %v637_v42 = vmax.f32 %v624_v34, 0.0 }
 0x2ad   :  { %v625_v23 = vpop.f32.mrf.mxu2 }
 0x2ae   :  { %v626_v32 = vadd.f32 %v625_v23, %v568_v30 }
 0x2b0   :  { %v638_v39 = vmax.f32 %v626_v32, 0.0 }
 0x2b2   :  { %v644_v46 = vpack.c.bf16 %v638_v39, %v637_v42 }
 0x2b5   :  { %v628_v26 = vpop.f32.mrf.mxu2 }
 0x2b6   :  { %v629_v29 = vadd.f32 %v628_v26, %v573_v25 }
 0x2b8   :  { %v639_v35 = vmax.f32 %v629_v29, 0.0 }
 0x2bd   :  { %v630_v31 = vpop.f32.mrf.mxu2 }
 0x2be   :  { %v631_v33 = vadd.f32 %v630_v31, %v578_v24 }
 0x2c0   :  { %v640_v36 = vmax.f32 %v631_v33, 0.0 }
 0x2c2   :  { %v645_v40 = vpack.c.bf16 %v640_v36, %v639_v35 }
 0x2c4   :  { %661 = vmatpush.bf16.msrb.mxu3 %v645_v40 }
 0x2c8   :  { %662 = vmatpush.bf16.msrb.mxu3 %v644_v46 }
 0x2cc   :  { %663 = vmatpush.bf16.msrb.mxu3 %v643_v53 }
 0x2d0   :  { %664 = vmatpush.bf16.msrb.mxu3 %v642_v59 }
 0x2d3   :  { %782 = vmatmul.msk.bf16.vlgmr.msrb.gmra.mxu3 %vm653_vm2, %v641_v60 }
 0x356   :  { %v666_v1 = vpop.f32.mrf.mxu3 }
 0x357   :  { %v667_v52 = vadd.f32 %v666_v1, %v652_v0 }
 0x359   :  { %v783_v57 = vmul.f32 -1.442695, %v667_v52 }
 0x35b   :  { %816 = vpow2.f32 %v783_v57 }
 0x35e   :  { %v668_v54 = vpop.f32.mrf.mxu3 }
 0x361   :  { %v817_v56 = vpop.eup %816 }
 0x362   :  { %v673_v51 = vadd.f32 1.0, %v817_v56 }
 0x364   :  { %818 = vrcp.f32 %v673_v51  ;;  %v685_v2 = vand.u32 2147483648, %v673_v51  ;;  %v683_v4 = vand.u32 2147483647, %v673_v51  ;;  %vm679_vm4 = vweird.f32 %v673_v51 }
 0x366   :  { %v686_v6 = vor.u32 1.1754944e-38, %v685_v2  ;;  %vm684_vm6 = vcmp.eq.f32.partialorder %v683_v4, 8.507059e+37 }
 0x36a   :  { %v819_v58 = vpop.eup %818 }
 0x36b   :  { %v675_v61 = vmul.f32 %v819_v58, %v673_v51  ;;  %vm680_vm3 = vweird.f32 %v819_v58 }
 0x36c   :  { %vm681_vm5 = vmor %vm679_vm4, %vm680_vm3 }
 0x36d   :  { %v676_v63 = vsub.f32 1.0, %v675_v61 }
 0x36f   :  { %v677_v3 = vmul.f32 %v819_v58, %v676_v63 }
 0x371   :  { %v678_v5 = vadd.f32 %v819_v58, %v677_v3 }
 0x373   :  { %v682_v7 = vsel %vm681_vm5, %v819_v58, %v678_v5 }
 0x374   :  { %v687_v8 = vsel %vm684_vm6, %v686_v6, %v682_v7 }
 0x375   :  { %689 = vst [vmem:[%s1083_s9] sm:$0x1] %v687_v8 }

</bundles_post_ra>
